<compile_context>
chip_gen: v7x
topology: tpu7x:2x2x1
jax: 0.10.0
libtpu: 0.0.40
codegen_flags: <defaults>
</compile_context>

<pallas_src>
import functools

import jax
import jax.numpy as jnp
from jax.experimental import pallas as pl
from jax.experimental.pallas import tpu as pltpu

_BN_EPS = 1e-5


def _conv_bn_relu_kernel(x_ref, w_ref, p_ref, o_ref, *, H, W):
    # x_ref: (N, Cin, (H+2)*(W+2))  bf16  spatially padded input, rows flattened
    # w_ref: (Cout, Kpad)           bf16  rows ordered (kh, kw, cin), K padded
    # p_ref: (Cout, 2)              f32   [:, 0] = gamma, [:, 1] = beta
    # o_ref: (N, Cout, H*W)         f32   lane-dense output rows
    N, Cin, _ = x_ref.shape
    Cout, Kpad = w_ref.shape
    Wp = W + 2
    K = Cin * 9
    # Conv evaluated on the padded-width flat axis: column p = h*Wp + w' is a
    # valid output iff w' < W.  L covers every valid position and keeps all 9
    # tap slices inside the (H+2)*(W+2) flat image.
    L = (H - 1) * Wp + W

    w_mat = w_ref[...]                      # (Cout, Kpad) bf16, hoisted
    gamma = p_ref[:, 0:1]                   # (Cout, 1)
    beta = p_ref[:, 1:2]                    # (Cout, 1)

    inv_n = 1.0 / float(N * H * W)
    s1 = jnp.zeros((Cout, 1), jnp.float32)
    s2 = jnp.zeros((Cout, 1), jnp.float32)
    y_all = []

    for n in range(N):                      # N small & static -> unrolled
        xs = x_ref[n]                       # (Cin, (H+2)*(W+2)) bf16
        # In-VMEM im2col: 9 contiguous lane slices of the flat padded image.
        taps = [xs[:, kh * Wp + kw: kh * Wp + kw + L]
                for kh in range(3) for kw in range(3)]
        if Kpad > K:                        # pad contraction dim 36 -> 40
            taps.append(jnp.zeros((Kpad - K, L), xs.dtype))
        patches = jnp.concatenate(taps, axis=0)          # (Kpad, L) bf16

        # One MXU matmul per sample: (Cout, Kpad) x (Kpad, L), f32 accumulate.
        y = jax.lax.dot_general(w_mat, patches, (((1,), (0,)), ((), ())),
                                preferred_element_type=jnp.float32)
        # Compact away the Wp-W garbage columns -> (Cout, H*W), lane dense.
        y_c = jnp.concatenate([y[:, h * Wp: h * Wp + W] for h in range(H)],
                              axis=1)
        s1 = s1 + jnp.sum(y_c, axis=1, keepdims=True)
        s2 = s2 + jnp.sum(y_c * y_c, axis=1, keepdims=True)
        y_all.append(y_c)

    # Training-mode BN batch statistics (biased variance), folded into a
    # single per-channel scale/shift.  TODO(synk): Welford/two-pass variance
    # for production magnitudes.
    mean = s1 * inv_n
    var = jnp.maximum(s2 * inv_n - mean * mean, 0.0)
    inv_std = jax.lax.rsqrt(var + _BN_EPS)
    scale = gamma * inv_std                 # (Cout, 1) broadcast along lanes
    shift = beta - mean * scale             # (Cout, 1)

    for n in range(N):
        o_ref[n] = jnp.maximum(y_all[n] * scale + shift, 0.0).astype(o_ref.dtype)


@jax.jit
def custom_layer_forward(x_nchw, w_oihw, bias, gamma, beta):
    """relu(batchnorm2d(conv2d(x, k=3, pad=1))) with training-mode batch stats.

    x_nchw: (N, Cin, H, W); w_oihw: (Cout, Cin, 3, 3) -- PyTorch conventions.
    `bias` is accepted for signature parity but unused: a per-channel conv
    bias is exactly cancelled by training-mode BatchNorm (the batch mean
    absorbs it), so dropping it keeps the output identical while removing a
    full-tensor add and one input DMA.
    """
    del bias
    N, Cin, H, W = x_nchw.shape
    Cout = w_oihw.shape[0]
    K = Cin * 9
    Kpad = ((K + 7) // 8) * 8

    # Cheap prep only (pad + flatten + bf16 cast) -- no HBM-side im2col.
    x_pad = jnp.pad(x_nchw, ((0, 0), (0, 0), (1, 1), (1, 1)))
    x_flat = x_pad.reshape(N, Cin, (H + 2) * (W + 2)).astype(jnp.bfloat16)

    # Weight rows ordered (kh, kw, cin) to match the kernel's tap order.
    w_mat = jnp.transpose(w_oihw, (0, 2, 3, 1)).reshape(Cout, K)
    w_mat = jnp.pad(w_mat, ((0, 0), (0, Kpad - K))).astype(jnp.bfloat16)

    params = jnp.stack([gamma, beta], axis=1).astype(jnp.float32)   # (Cout, 2)

    vmem = pl.BlockSpec(memory_space=pltpu.MemorySpace.VMEM)
    out = pl.pallas_call(
        functools.partial(_conv_bn_relu_kernel, H=H, W=W),
        out_shape=jax.ShapeDtypeStruct((N, Cout, H * W), x_nchw.dtype),
        in_specs=[vmem, vmem, vmem],
        out_specs=vmem,
        compiler_params=pltpu.CompilerParams(vmem_limit_bytes=32 * 1024 * 1024),
    )(x_flat, w_mat, params)

    # Contiguous reshape only (NCHW), no transpose / extra HBM pass.
    return out.reshape(N, Cout, H, W)


def _reference_forward(x, w, b, gamma, beta):
    """Pure-JAX reference: conv + training-mode BN (biased var) + ReLU."""
    y = jax.lax.conv_general_dilated(
        x, w, window_strides=(1, 1), padding=((1, 1), (1, 1)),
        dimension_numbers=("NCHW", "OIHW", "NCHW"))
    y = y + b[None, :, None, None]
    mean = jnp.mean(y, axis=(0, 2, 3), keepdims=True)
    var = jnp.mean((y - mean) ** 2, axis=(0, 2, 3), keepdims=True)
    y = (y - mean) * jax.lax.rsqrt(var + _BN_EPS)
    y = y * gamma[None, :, None, None] + beta[None, :, None, None]
    return jnp.maximum(y, 0.0)


if __name__ == "__main__":
    key = jax.random.PRNGKey(0)
    k_x, k_w, k_b, k_g, k_beta = jax.random.split(key, 5)

    N, Cin, Cout, H, W = 2, 4, 8, 16, 16

    x = jax.random.normal(k_x, (N, Cin, H, W), dtype=jnp.float32)
    # Deterministic synthetic parameters (shapes match nn.Conv2d / nn.BatchNorm2d).
    w = jax.random.normal(k_w, (Cout, Cin, 3, 3), dtype=jnp.float32) * 0.1
    b = jax.random.normal(k_b, (Cout,), dtype=jnp.float32) * 0.1
    gamma = 1.0 + 0.1 * jax.random.normal(k_g, (Cout,), dtype=jnp.float32)
    beta = 0.1 * jax.random.normal(k_beta, (Cout,), dtype=jnp.float32)

    out = custom_layer_forward(x, w, b, gamma, beta)
    jax.block_until_ready(out)

    assert out.shape == (N, Cout, H, W)
    assert bool(jnp.all(out >= 0.0))        # ReLU output is non-negative

    # Reference includes the conv bias -- this also validates that the
    # bias-cancellation-by-BN optimization is exact (up to fp).  Tolerance
    # covers the bf16 MXU operands.
    ref = _reference_forward(x, w, b, gamma, beta)
    max_diff = float(jnp.max(jnp.abs(out - ref)))
    assert bool(jnp.allclose(out, ref, atol=2e-2, rtol=2e-2)), max_diff

    print("KERNEL_OK")
</pallas_src>

<mosaic_0001>
module attributes {stable_mosaic.version = 11 : i64} {
  func.func @_conv_bn_relu_kernel(%arg0: memref<2x4x324xbf16, #tpu.memory_space<vmem>>, %arg1: memref<8x40xbf16, #tpu.memory_space<vmem>>, %arg2: memref<8x2xf32, #tpu.memory_space<vmem>>, %arg3: memref<2x8x256xf32, #tpu.memory_space<vmem>>) attributes {dimension_semantics = [], scalar_prefetch = 0 : i64, scratch_operands = 0 : i64, tpu.core_type = #tpu.core_type<tc>} {
    %c0 = arith.constant 0 : index
    %c0_0 = arith.constant 0 : index
    %0 = vector.load %arg1[%c0, %c0_0] : memref<8x40xbf16, #tpu.memory_space<vmem>>, vector<8x40xbf16>
    %c0_1 = arith.constant 0 : index
    %c0_2 = arith.constant 0 : index
    %1 = vector.load %arg2[%c0_1, %c0_2] : memref<8x2xf32, #tpu.memory_space<vmem>>, vector<8x1xf32>
    %c0_3 = arith.constant 0 : index
    %c1 = arith.constant 1 : index
    %2 = vector.load %arg2[%c0_3, %c1] : memref<8x2xf32, #tpu.memory_space<vmem>>, vector<8x1xf32>
    %cst = arith.constant 0.000000e+00 : f32
    %3 = vector.broadcast %cst : f32 to vector<8x1xf32>
    %cst_4 = arith.constant 0.000000e+00 : f32
    %4 = vector.broadcast %cst_4 : f32 to vector<8x1xf32>
    %c0_5 = arith.constant 0 : index
    %c0_6 = arith.constant 0 : index
    %c0_7 = arith.constant 0 : index
    %5 = vector.load %arg0[%c0_5, %c0_6, %c0_7] : memref<2x4x324xbf16, #tpu.memory_space<vmem>>, vector<1x4x324xbf16>
    %6 = vector.shape_cast %5 : vector<1x4x324xbf16> to vector<4x324xbf16>
    %7 = vector.extract_strided_slice %6 {offsets = [0, 0], sizes = [4, 286], strides = [1, 1]} : vector<4x324xbf16> to vector<4x286xbf16>
    %8 = vector.extract_strided_slice %6 {offsets = [0, 1], sizes = [4, 286], strides = [1, 1]} : vector<4x324xbf16> to vector<4x286xbf16>
    %9 = vector.extract_strided_slice %6 {offsets = [0, 2], sizes = [4, 286], strides = [1, 1]} : vector<4x324xbf16> to vector<4x286xbf16>
    %10 = vector.extract_strided_slice %6 {offsets = [0, 18], sizes = [4, 286], strides = [1, 1]} : vector<4x324xbf16> to vector<4x286xbf16>
    %11 = vector.extract_strided_slice %6 {offsets = [0, 19], sizes = [4, 286], strides = [1, 1]} : vector<4x324xbf16> to vector<4x286xbf16>
    %12 = vector.extract_strided_slice %6 {offsets = [0, 20], sizes = [4, 286], strides = [1, 1]} : vector<4x324xbf16> to vector<4x286xbf16>
    %13 = vector.extract_strided_slice %6 {offsets = [0, 36], sizes = [4, 286], strides = [1, 1]} : vector<4x324xbf16> to vector<4x286xbf16>
    %14 = vector.extract_strided_slice %6 {offsets = [0, 37], sizes = [4, 286], strides = [1, 1]} : vector<4x324xbf16> to vector<4x286xbf16>
    %15 = vector.extract_strided_slice %6 {offsets = [0, 38], sizes = [4, 286], strides = [1, 1]} : vector<4x324xbf16> to vector<4x286xbf16>
    %cst_8 = arith.constant 0.000000e+00 : bf16
    %16 = vector.broadcast %cst_8 : bf16 to vector<4x286xbf16>
    %17 = tpu.concatenate %7, %8, %9, %10, %11, %12, %13, %14, %15, %16 in 0 : vector<4x286xbf16>, vector<4x286xbf16>, vector<4x286xbf16>, vector<4x286xbf16>, vector<4x286xbf16>, vector<4x286xbf16>, vector<4x286xbf16>, vector<4x286xbf16>, vector<4x286xbf16>, vector<4x286xbf16> -> vector<40x286xbf16>
    %cst_9 = arith.constant dense<0.000000e+00> : vector<8x286xf32>
    %18 = tpu.matmul %0, %17, %cst_9 {dimension_numbers = #tpu.dot_dimension_numbers<[1], [0], [0], [1], [0, 0, 1, 1], [], []>} : vector<8x40xbf16>, vector<40x286xbf16>, vector<8x286xf32> -> vector<8x286xf32>
    %19 = vector.extract_strided_slice %18 {offsets = [0, 0], sizes = [8, 16], strides = [1, 1]} : vector<8x286xf32> to vector<8x16xf32>
    %20 = vector.extract_strided_slice %18 {offsets = [0, 18], sizes = [8, 16], strides = [1, 1]} : vector<8x286xf32> to vector<8x16xf32>
    %21 = vector.extract_strided_slice %18 {offsets = [0, 36], sizes = [8, 16], strides = [1, 1]} : vector<8x286xf32> to vector<8x16xf32>
    %22 = vector.extract_strided_slice %18 {offsets = [0, 54], sizes = [8, 16], strides = [1, 1]} : vector<8x286xf32> to vector<8x16xf32>
    %23 = vector.extract_strided_slice %18 {offsets = [0, 72], sizes = [8, 16], strides = [1, 1]} : vector<8x286xf32> to vector<8x16xf32>
    %24 = vector.extract_strided_slice %18 {offsets = [0, 90], sizes = [8, 16], strides = [1, 1]} : vector<8x286xf32> to vector<8x16xf32>
    %25 = vector.extract_strided_slice %18 {offsets = [0, 108], sizes = [8, 16], strides = [1, 1]} : vector<8x286xf32> to vector<8x16xf32>
    %26 = vector.extract_strided_slice %18 {offsets = [0, 126], sizes = [8, 16], strides = [1, 1]} : vector<8x286xf32> to vector<8x16xf32>
    %27 = vector.extract_strided_slice %18 {offsets = [0, 144], sizes = [8, 16], strides = [1, 1]} : vector<8x286xf32> to vector<8x16xf32>
    %28 = vector.extract_strided_slice %18 {offsets = [0, 162], sizes = [8, 16], strides = [1, 1]} : vector<8x286xf32> to vector<8x16xf32>
    %29 = vector.extract_strided_slice %18 {offsets = [0, 180], sizes = [8, 16], strides = [1, 1]} : vector<8x286xf32> to vector<8x16xf32>
    %30 = vector.extract_strided_slice %18 {offsets = [0, 198], sizes = [8, 16], strides = [1, 1]} : vector<8x286xf32> to vector<8x16xf32>
    %31 = vector.extract_strided_slice %18 {offsets = [0, 216], sizes = [8, 16], strides = [1, 1]} : vector<8x286xf32> to vector<8x16xf32>
    %32 = vector.extract_strided_slice %18 {offsets = [0, 234], sizes = [8, 16], strides = [1, 1]} : vector<8x286xf32> to vector<8x16xf32>
    %33 = vector.extract_strided_slice %18 {offsets = [0, 252], sizes = [8, 16], strides = [1, 1]} : vector<8x286xf32> to vector<8x16xf32>
    %34 = vector.extract_strided_slice %18 {offsets = [0, 270], sizes = [8, 16], strides = [1, 1]} : vector<8x286xf32> to vector<8x16xf32>
    %35 = tpu.concatenate %19, %20, %21, %22, %23, %24, %25, %26, %27, %28, %29, %30, %31, %32, %33, %34 in 1 : vector<8x16xf32>, vector<8x16xf32>, vector<8x16xf32>, vector<8x16xf32>, vector<8x16xf32>, vector<8x16xf32>, vector<8x16xf32>, vector<8x16xf32>, vector<8x16xf32>, vector<8x16xf32>, vector<8x16xf32>, vector<8x16xf32>, vector<8x16xf32>, vector<8x16xf32>, vector<8x16xf32>, vector<8x16xf32> -> vector<8x256xf32>
    %cst_10 = arith.constant dense<0.000000e+00> : vector<8xf32>
    %36 = vector.multi_reduction <add>, %35, %cst_10 [1] : vector<8x256xf32> to vector<8xf32>
    %37 = vector.shape_cast %36 : vector<8xf32> to vector<8x1xf32>
    %38 = arith.addf %3, %37 : vector<8x1xf32>
    %39 = arith.mulf %35, %35 : vector<8x256xf32>
    %cst_11 = arith.constant dense<0.000000e+00> : vector<8xf32>
    %40 = vector.multi_reduction <add>, %39, %cst_11 [1] : vector<8x256xf32> to vector<8xf32>
    %41 = vector.shape_cast %40 : vector<8xf32> to vector<8x1xf32>
    %42 = arith.addf %4, %41 : vector<8x1xf32>
    %c1_12 = arith.constant 1 : index
    %c0_13 = arith.constant 0 : index
    %c0_14 = arith.constant 0 : index
    %43 = vector.load %arg0[%c1_12, %c0_13, %c0_14] : memref<2x4x324xbf16, #tpu.memory_space<vmem>>, vector<1x4x324xbf16>
    %44 = vector.shape_cast %43 : vector<1x4x324xbf16> to vector<4x324xbf16>
    %45 = vector.extract_strided_slice %44 {offsets = [0, 0], sizes = [4, 286], strides = [1, 1]} : vector<4x324xbf16> to vector<4x286xbf16>
    %46 = vector.extract_strided_slice %44 {offsets = [0, 1], sizes = [4, 286], strides = [1, 1]} : vector<4x324xbf16> to vector<4x286xbf16>
    %47 = vector.extract_strided_slice %44 {offsets = [0, 2], sizes = [4, 286], strides = [1, 1]} : vector<4x324xbf16> to vector<4x286xbf16>
    %48 = vector.extract_strided_slice %44 {offsets = [0, 18], sizes = [4, 286], strides = [1, 1]} : vector<4x324xbf16> to vector<4x286xbf16>
    %49 = vector.extract_strided_slice %44 {offsets = [0, 19], sizes = [4, 286], strides = [1, 1]} : vector<4x324xbf16> to vector<4x286xbf16>
    %50 = vector.extract_strided_slice %44 {offsets = [0, 20], sizes = [4, 286], strides = [1, 1]} : vector<4x324xbf16> to vector<4x286xbf16>
    %51 = vector.extract_strided_slice %44 {offsets = [0, 36], sizes = [4, 286], strides = [1, 1]} : vector<4x324xbf16> to vector<4x286xbf16>
    %52 = vector.extract_strided_slice %44 {offsets = [0, 37], sizes = [4, 286], strides = [1, 1]} : vector<4x324xbf16> to vector<4x286xbf16>
    %53 = vector.extract_strided_slice %44 {offsets = [0, 38], sizes = [4, 286], strides = [1, 1]} : vector<4x324xbf16> to vector<4x286xbf16>
    %cst_15 = arith.constant 0.000000e+00 : bf16
    %54 = vector.broadcast %cst_15 : bf16 to vector<4x286xbf16>
    %55 = tpu.concatenate %45, %46, %47, %48, %49, %50, %51, %52, %53, %54 in 0 : vector<4x286xbf16>, vector<4x286xbf16>, vector<4x286xbf16>, vector<4x286xbf16>, vector<4x286xbf16>, vector<4x286xbf16>, vector<4x286xbf16>, vector<4x286xbf16>, vector<4x286xbf16>, vector<4x286xbf16> -> vector<40x286xbf16>
    %cst_16 = arith.constant dense<0.000000e+00> : vector<8x286xf32>
    %56 = tpu.matmul %0, %55, %cst_16 {dimension_numbers = #tpu.dot_dimension_numbers<[1], [0], [0], [1], [0, 0, 1, 1], [], []>} : vector<8x40xbf16>, vector<40x286xbf16>, vector<8x286xf32> -> vector<8x286xf32>
    %57 = vector.extract_strided_slice %56 {offsets = [0, 0], sizes = [8, 16], strides = [1, 1]} : vector<8x286xf32> to vector<8x16xf32>
    %58 = vector.extract_strided_slice %56 {offsets = [0, 18], sizes = [8, 16], strides = [1, 1]} : vector<8x286xf32> to vector<8x16xf32>
    %59 = vector.extract_strided_slice %56 {offsets = [0, 36], sizes = [8, 16], strides = [1, 1]} : vector<8x286xf32> to vector<8x16xf32>
    %60 = vector.extract_strided_slice %56 {offsets = [0, 54], sizes = [8, 16], strides = [1, 1]} : vector<8x286xf32> to vector<8x16xf32>
    %61 = vector.extract_strided_slice %56 {offsets = [0, 72], sizes = [8, 16], strides = [1, 1]} : vector<8x286xf32> to vector<8x16xf32>
    %62 = vector.extract_strided_slice %56 {offsets = [0, 90], sizes = [8, 16], strides = [1, 1]} : vector<8x286xf32> to vector<8x16xf32>
    %63 = vector.extract_strided_slice %56 {offsets = [0, 108], sizes = [8, 16], strides = [1, 1]} : vector<8x286xf32> to vector<8x16xf32>
    %64 = vector.extract_strided_slice %56 {offsets = [0, 126], sizes = [8, 16], strides = [1, 1]} : vector<8x286xf32> to vector<8x16xf32>
    %65 = vector.extract_strided_slice %56 {offsets = [0, 144], sizes = [8, 16], strides = [1, 1]} : vector<8x286xf32> to vector<8x16xf32>
    %66 = vector.extract_strided_slice %56 {offsets = [0, 162], sizes = [8, 16], strides = [1, 1]} : vector<8x286xf32> to vector<8x16xf32>
    %67 = vector.extract_strided_slice %56 {offsets = [0, 180], sizes = [8, 16], strides = [1, 1]} : vector<8x286xf32> to vector<8x16xf32>
    %68 = vector.extract_strided_slice %56 {offsets = [0, 198], sizes = [8, 16], strides = [1, 1]} : vector<8x286xf32> to vector<8x16xf32>
    %69 = vector.extract_strided_slice %56 {offsets = [0, 216], sizes = [8, 16], strides = [1, 1]} : vector<8x286xf32> to vector<8x16xf32>
    %70 = vector.extract_strided_slice %56 {offsets = [0, 234], sizes = [8, 16], strides = [1, 1]} : vector<8x286xf32> to vector<8x16xf32>
    %71 = vector.extract_strided_slice %56 {offsets = [0, 252], sizes = [8, 16], strides = [1, 1]} : vector<8x286xf32> to vector<8x16xf32>
    %72 = vector.extract_strided_slice %56 {offsets = [0, 270], sizes = [8, 16], strides = [1, 1]} : vector<8x286xf32> to vector<8x16xf32>
    %73 = tpu.concatenate %57, %58, %59, %60, %61, %62, %63, %64, %65, %66, %67, %68, %69, %70, %71, %72 in 1 : vector<8x16xf32>, vector<8x16xf32>, vector<8x16xf32>, vector<8x16xf32>, vector<8x16xf32>, vector<8x16xf32>, vector<8x16xf32>, vector<8x16xf32>, vector<8x16xf32>, vector<8x16xf32>, vector<8x16xf32>, vector<8x16xf32>, vector<8x16xf32>, vector<8x16xf32>, vector<8x16xf32>, vector<8x16xf32> -> vector<8x256xf32>
    %cst_17 = arith.constant dense<0.000000e+00> : vector<8xf32>
    %74 = vector.multi_reduction <add>, %73, %cst_17 [1] : vector<8x256xf32> to vector<8xf32>
    %75 = vector.shape_cast %74 : vector<8xf32> to vector<8x1xf32>
    %76 = arith.addf %38, %75 : vector<8x1xf32>
    %77 = arith.mulf %73, %73 : vector<8x256xf32>
    %cst_18 = arith.constant dense<0.000000e+00> : vector<8xf32>
    %78 = vector.multi_reduction <add>, %77, %cst_18 [1] : vector<8x256xf32> to vector<8xf32>
    %79 = vector.shape_cast %78 : vector<8xf32> to vector<8x1xf32>
    %80 = arith.addf %42, %79 : vector<8x1xf32>
    %cst_19 = arith.constant 0.001953125 : f32
    %81 = vector.broadcast %cst_19 : f32 to vector<8x1xf32>
    %82 = arith.mulf %76, %81 : vector<8x1xf32>
    %cst_20 = arith.constant 0.001953125 : f32
    %83 = vector.broadcast %cst_20 : f32 to vector<8x1xf32>
    %84 = arith.mulf %80, %83 : vector<8x1xf32>
    %85 = arith.mulf %82, %82 : vector<8x1xf32>
    %86 = arith.subf %84, %85 : vector<8x1xf32>
    %cst_21 = arith.constant 0.000000e+00 : f32
    %87 = vector.broadcast %cst_21 : f32 to vector<8x1xf32>
    %88 = arith.maximumf %86, %87 : vector<8x1xf32>
    %cst_22 = arith.constant 9.99999974E-6 : f32
    %89 = vector.broadcast %cst_22 : f32 to vector<8x1xf32>
    %90 = arith.addf %88, %89 : vector<8x1xf32>
    %91 = math.rsqrt %90 : vector<8x1xf32>
    %92 = arith.mulf %1, %91 : vector<8x1xf32>
    %93 = arith.mulf %82, %92 : vector<8x1xf32>
    %94 = arith.subf %2, %93 : vector<8x1xf32>
    %95 = vector.broadcast %92 : vector<8x1xf32> to vector<8x256xf32>
    %96 = arith.mulf %35, %95 : vector<8x256xf32>
    %97 = vector.broadcast %94 : vector<8x1xf32> to vector<8x256xf32>
    %98 = arith.addf %96, %97 : vector<8x256xf32>
    %cst_23 = arith.constant 0.000000e+00 : f32
    %99 = vector.broadcast %cst_23 : f32 to vector<8x256xf32>
    %100 = arith.maximumf %98, %99 : vector<8x256xf32>
    %c0_24 = arith.constant 0 : index
    %c0_25 = arith.constant 0 : index
    %c0_26 = arith.constant 0 : index
    %101 = vector.load %arg3[%c0_24, %c0_25, %c0_26] : memref<2x8x256xf32, #tpu.memory_space<vmem>>, vector<1x8x256xf32>
    %102 = vector.shape_cast %101 : vector<1x8x256xf32> to vector<8x256xf32>
    %103 = vector.shape_cast %100 : vector<8x256xf32> to vector<1x8x256xf32>
    tpu.vector_store %arg3[%c0_24, %c0_25, %c0_26], %103 {strides = array<i32>} : memref<2x8x256xf32, #tpu.memory_space<vmem>>, vector<1x8x256xf32>,
    %104 = vector.broadcast %92 : vector<8x1xf32> to vector<8x256xf32>
    %105 = arith.mulf %73, %104 : vector<8x256xf32>
    %106 = vector.broadcast %94 : vector<8x1xf32> to vector<8x256xf32>
    %107 = arith.addf %105, %106 : vector<8x256xf32>
    %cst_27 = arith.constant 0.000000e+00 : f32
    %108 = vector.broadcast %cst_27 : f32 to vector<8x256xf32>
    %109 = arith.maximumf %107, %108 : vector<8x256xf32>
    %c1_28 = arith.constant 1 : index
    %c0_29 = arith.constant 0 : index
    %c0_30 = arith.constant 0 : index
    %110 = vector.load %arg3[%c1_28, %c0_29, %c0_30] : memref<2x8x256xf32, #tpu.memory_space<vmem>>, vector<1x8x256xf32>
    %111 = vector.shape_cast %110 : vector<1x8x256xf32> to vector<8x256xf32>
    %112 = vector.shape_cast %109 : vector<8x256xf32> to vector<1x8x256xf32>
    tpu.vector_store %arg3[%c1_28, %c0_29, %c0_30], %112 {strides = array<i32>} : memref<2x8x256xf32, #tpu.memory_space<vmem>>, vector<1x8x256xf32>,
    return
  }
}

</mosaic_0001>

<bundles_post_ra>
// kernel: custom_layer_forward.1
= control target key start
LH: loop header
LB: loop body
LE: loop exit
PB: predicated region body
PF: predicated region fallthrough
CT: control target
= control target key end

     0   :  { %v23_v0 = vlaneseq  ;;  %v786_v2 = vmov 1983009808   ;;  %s787_s14 = smov 127   ;;  %v788_v13 = vmov 0.0   ;;  %s789_s15 = smov 126   ;;  %vm794_vm0 = vmmov 0   ;;  %s1123_s0 = inlined_call_operand.vmem [shape: bf16[2,4,324], index: 0, kind: input, shape index: {}]   ;;  %s1124_s1 = inlined_call_operand.vmem [shape: bf16[8,40], index: 1, kind: input, shape index: {}]   ;;  %s1125_s2 = inlined_call_operand.vmem [shape: f32[8,2], index: 2, kind: input, shape index: {}]   ;;  %s1126_s3 = inlined_call_operand.vmem [shape: f32[2,8,256], index: 3, kind: output, shape index: {}]  }
   0x1   :  { %v17_v1 = vld [vmem:[%s1123_s0] sm:$0x3f]  ;;  %v21_v3 = vunpack.c.l.s4 %v786_v2  ;;  %731 = vmatprep.subr.bf16.mxu1 %v788_v13  ;;  %s790_s16 = smov 110   ;;  %s791_s17 = smov 109   ;;  %v717_v18 = vld [vmem:[%s1123_s0 + $0x6] sm:$0x3f]  ;;  %737 = vmatprep.mubr.msk.bf16.mxu1 %vm794_vm0, %v788_v13 }
   0x2   :  { %v24_v4 = vshrl.u32 %v23_v0, 7  ;;  %v35_v6 = vcombine.low %v17_v1, %v17_v1  ;;  %v19_v8 = vcombine.high %v17_v1, %v17_v1  ;;  %s792_s18 = smov 108   ;;  %s793_s19 = smov 92   ;;  %v374_v19 = vcombine.low %v717_v18, %v717_v18 }
   0x3   :  { %v22_v5 = vunpack.c.0.s8 %v21_v3  ;;  %s795_s22 = smov 91   ;;  %v796_v20 = vmov 0   ;;  %s797_s23 = smov 90   ;;  %v358_v24 = vcombine.high %v717_v18, %v717_v18  ;;  %vm50_vm1 = vcmask 1039360  }
   0x4   :  { %219 = vmatprep.mubr.bf16.mxu0 %v796_v20  ;;  %777 = vset.pattern.permute.xlu0 %v796_v20  ;;  %vm61_vm2 = vcmask 1031168   ;;  %vm119_vm3 = vcmask 1041408   ;;  %vm129_vm4 = vcmask 1043456   ;;  %vm71_vm5 = vcmask 900096   ;;  %s799_s25 = smov 114   ;;  %s800_s26 = smov 124  }
   0x5   :  { %v25_v7 = vsub.s32 %v22_v5, %v24_v4  ;;  %vm136_vm6 = vcmask 1045504   ;;  %vm89_vm7 = vcmask 883712   ;;  %vm98_vm8 = vcmask 752640   ;;  %s801_s27 = smov 112   ;;  %s802_s28 = smov 122  }
   0x6   :  { %vm80_vm9 = vcmask 891904   ;;  %vm107_vm10 = vcmask 744448   ;;  %vm116_vm11 = vcmask 736256   ;;  %vm177_vm12 = vcmask 326656   ;;  %s803_s29 = smov 120   ;;  %s804_s30 = smov 106  }
   0x7   :  { %v42_v9 = vrot.slane %v35_v6, %v25_v7  ;;  %v835_v10 = vrot.slane %v17_v1, %v25_v7  ;;  %v840_v12 = vrot.slane %v19_v8, %v25_v7  ;;  %v381_v21 = vrot.slane %v374_v19, %v25_v7  ;;  %s805_s4 = smov 118   ;;  %s806_s5 = smov 104  }
   0x8   :  { %v885_v22 = vrot.slane %v717_v18, %v25_v7  ;;  %v894_v25 = vrot.slane %v358_v24, %v25_v7  ;;  %s807_s6 = smov 116   ;;  %s808_s7 = smov 102   ;;  %vm324_vm13 = vcmask 130048   ;;  %vm326_vm14 = vcmask 261120  }
   0x9   :  { %44 = vrot.lane.b32.xlu1 %v42_v9, %s787_s14  ;;  %48 = vrot.lane.b32.xlu0 %v835_v10, %s787_s14  ;;  %v43_v11 = vcombine.high %v42_v9, %v42_v9  ;;  %v53_v14 = vcombine.low %v835_v10, %v835_v10  ;;  %v54_v15 = vcombine.low %v840_v12, %v840_v12  ;;  %s809_s8 = smov 98   ;;  %vm328_vm15 = vcmask 392192   ;;  %s811_s11 = smov 1  }
   0xa   :  { %v856_v16 = vcombine.high %v835_v10, %v835_v10  ;;  %v64_v17 = vcombine.low %v42_v9, %v42_v9  ;;  %v382_v23 = vcombine.high %v381_v21, %v381_v21  ;;  %v391_v26 = vcombine.low %v885_v22, %v885_v22 }
   0xb   :  { %v392_v27 = vcombine.low %v894_v25, %v894_v25  ;;  %v909_v28 = vcombine.high %v885_v22, %v885_v22  ;;  %v401_v29 = vcombine.low %v381_v21, %v381_v21 }
   0xd   :  { %57 = vrot.lane.b32.xlu1 %v835_v10, %s789_s15  ;;  %46 = vrot.lane.b32.xlu0 %v43_v11, %s787_s14 }
  0x11   :  { %55 = vrot.lane.b32.xlu1 %v53_v14, %s789_s15  ;;  %59 = vrot.lane.b32.xlu0 %v54_v15, %s789_s15 }
  0x15   :  { %69 = vrot.lane.b32.xlu1 %v53_v14, %s790_s16  ;;  %67 = vrot.lane.b32.xlu0 %v42_v9, %s790_s16 }
  0x19   :  { %76 = vrot.lane.b32.xlu1 %v856_v16, %s791_s17  ;;  %65 = vrot.lane.b32.xlu0 %v64_v17, %s790_s16 }
  0x1d   :  { %85 = vrot.lane.b32.xlu1 %v43_v11, %s792_s18  ;;  %78 = vrot.lane.b32.xlu0 %v840_v12, %s791_s17 }
  0x21   :  { %74 = vrot.lane.b32.xlu1 %v835_v10, %s791_s17  ;;  %87 = vrot.lane.b32.xlu0 %v835_v10, %s792_s18 }
  0x25   :  { %94 = vrot.lane.b32.xlu1 %v835_v10, %s793_s19  ;;  %83 = vrot.lane.b32.xlu0 %v42_v9, %s792_s18 }
  0x29   :  { %92 = vrot.lane.b32.xlu1 %v53_v14, %s793_s19  ;;  %96 = vrot.lane.b32.xlu0 %v54_v15, %s793_s19 }
  0x2d   :  { %105 = vrot.lane.b32.xlu1 %v53_v14, %s795_s22  ;;  %103 = vrot.lane.b32.xlu0 %v42_v9, %s795_s22 }
  0x31   :  { %110 = vrot.lane.b32.xlu1 %v835_v10, %s797_s23  ;;  %101 = vrot.lane.b32.xlu0 %v64_v17, %s795_s22 }
  0x35   :  { %114 = vrot.lane.b32.xlu1 %v840_v12, %s797_s23  ;;  %112 = vrot.lane.b32.xlu0 %v856_v16, %s797_s23 }
  0x39   :  { %387 = vrot.lane.b32.xlu1 %v885_v22, %s787_s14  ;;  %385 = vrot.lane.b32.xlu0 %v382_v23, %s787_s14 }
  0x3d   :  { %395 = vrot.lane.b32.xlu1 %v885_v22, %s789_s15  ;;  %383 = vrot.lane.b32.xlu0 %v381_v21, %s787_s14 }
  0x41   :  { %393 = vrot.lane.b32.xlu1 %v391_v26, %s789_s15  ;;  %397 = vrot.lane.b32.xlu0 %v392_v27, %s789_s15 }
  0x45   :  { %406 = vrot.lane.b32.xlu1 %v391_v26, %s790_s16  ;;  %404 = vrot.lane.b32.xlu0 %v381_v21, %s790_s16 }
  0x49   :  { %412 = vrot.lane.b32.xlu1 %v909_v28, %s791_s17  ;;  %402 = vrot.lane.b32.xlu0 %v401_v29, %s790_s16 }
  0x4d   :  { %420 = vrot.lane.b32.xlu1 %v382_v23, %s792_s18  ;;  %414 = vrot.lane.b32.xlu0 %v894_v25, %s791_s17 }
  0x51   :  { %410 = vrot.lane.b32.xlu1 %v885_v22, %s791_s17  ;;  %422 = vrot.lane.b32.xlu0 %v885_v22, %s792_s18 }
  0x55   :  { %428 = vrot.lane.b32.xlu1 %v885_v22, %s793_s19  ;;  %418 = vrot.lane.b32.xlu0 %v381_v21, %s792_s18 }
  0x59   :  { %426 = vrot.lane.b32.xlu1 %v391_v26, %s793_s19  ;;  %430 = vrot.lane.b32.xlu0 %v392_v27, %s793_s19 }
  0x5d   :  { %438 = vrot.lane.b32.xlu1 %v391_v26, %s795_s22  ;;  %436 = vrot.lane.b32.xlu0 %v381_v21, %s795_s22 }
  0x61   :  { %442 = vrot.lane.b32.xlu1 %v885_v22, %s797_s23  ;;  %434 = vrot.lane.b32.xlu0 %v401_v29, %s795_s22 }
  0x65   :  { %446 = vrot.lane.b32.xlu1 %v894_v25, %s797_s23  ;;  %444 = vrot.lane.b32.xlu0 %v909_v28, %s797_s23 }
  0x7b   :  { %v45_v30 = vpop.permute.xlu1 %44  ;;  %v49_v31 = vpop.permute.xlu0 %48 }
  0x7c   :  { %v128_v38 = vsel %vm119_vm3, %v840_v12, %v49_v31 }
  0x7f   :  { %v58_v32 = vpop.permute.xlu1 %57  ;;  %v47_v33 = vpop.permute.xlu0 %46 }
  0x80   :  { %v52_v36 = vsel %vm50_vm1, %v47_v33, %v49_v31  ;;  %v51_v43 = vsel %vm50_vm1, %v45_v30, %v47_v33 }
  0x81   :  { %v125_v39 = vsel %vm119_vm3, %v856_v16, %v52_v36  ;;  %v122_v49 = vsel %vm119_vm3, %v835_v10, %v51_v43 }
  0x83   :  { %v56_v34 = vpop.permute.xlu1 %55  ;;  %v60_v35 = vpop.permute.xlu0 %59 }
  0x84   :  { %v63_v37 = vsel %vm61_vm2, %v58_v32, %v60_v35  ;;  %v135_v40 = vsel %vm129_vm4, %v128_v38, %v60_v35  ;;  %v62_v47 = vsel %vm61_vm2, %v56_v34, %v58_v32  ;;  %v983_v34 = vld [vmem:[%s1124_s1] sm:$0xf]  ;;  %s798_s1 = smov 100  }
  0x85   :  { %v133_v46 = vsel %vm129_vm4, %v125_v39, %v63_v37  ;;  %v131_v53 = vsel %vm129_vm4, %v122_v49, %v62_v47 }
  0x87   :  { %v70_v41 = vpop.permute.xlu1 %69  ;;  %v68_v42 = vpop.permute.xlu0 %67 }
  0x88   :  { %v73_v44 = vsel %vm71_vm5, %v68_v42, %v70_v41  ;;  %v144_v45 = vsel %vm136_vm6, %v135_v40, %v70_v41 }
  0x89   :  { %732 = vmatpush3.bf16.msra.mxu1 %v144_v45  ;;  %v141_v48 = vsel %vm136_vm6, %v133_v46, %v73_v44 }
  0x8a   :  { %187 = vmatprep.subr.bf16.mxu0 %v141_v48  ;;  %733 = vmatprep.subr.bf16.mxu1 %v788_v13 }
  0x8b   :  { %v77_v50 = vpop.permute.xlu1 %76  ;;  %v66_v51 = vpop.permute.xlu0 %65 }
  0x8c   :  { %v72_v52 = vsel %vm71_vm5, %v66_v51, %v68_v42 }
  0x8d   :  { %v138_v54 = vsel %vm136_vm6, %v131_v53, %v72_v52 }
  0x8e   :  { %188 = vmatpush1.bf16.msra.mxu0 %v138_v54 }
  0x8f   :  { %v86_v55 = vpop.permute.xlu1 %85  ;;  %v79_v56 = vpop.permute.xlu0 %78 }
  0x90   :  { %v82_v1 = vsel %vm80_vm9, %v77_v50, %v79_v56 }
  0x93   :  { %v75_v57 = vpop.permute.xlu1 %74  ;;  %v88_v58 = vpop.permute.xlu0 %87 }
  0x94   :  { %v91_v63 = vsel %vm89_vm7, %v86_v55, %v88_v58  ;;  %v154_v2 = vsel %vm119_vm3, %v79_v56, %v88_v58  ;;  %v81_v14 = vsel %vm80_vm9, %v75_v57, %v77_v50 }
  0x95   :  { %v151_v3 = vsel %vm119_vm3, %v82_v1, %v91_v63 }
  0x97   :  { %v95_v59 = vpop.permute.xlu1 %94  ;;  %v84_v60 = vpop.permute.xlu0 %83 }
  0x98   :  { %v90_v7 = vsel %vm89_vm7, %v84_v60, %v86_v55 }
  0x99   :  { %v148_v15 = vsel %vm119_vm3, %v81_v14, %v90_v7 }
  0x9b   :  { %v93_v61 = vpop.permute.xlu1 %92  ;;  %v97_v62 = vpop.permute.xlu0 %96 }
  0x9c   :  { %v100_v0 = vsel %vm98_vm8, %v95_v59, %v97_v62  ;;  %v160_v4 = vsel %vm129_vm4, %v154_v2, %v97_v62  ;;  %v99_v11 = vsel %vm98_vm8, %v93_v61, %v95_v59 }
  0x9d   :  { %v158_v10 = vsel %vm129_vm4, %v151_v3, %v100_v0  ;;  %v156_v19 = vsel %vm129_vm4, %v148_v15, %v99_v11 }
  0x9f   :  { %v106_v5 = vpop.permute.xlu1 %105  ;;  %v104_v6 = vpop.permute.xlu0 %103 }
  0xa0   :  { %v109_v8 = vsel %vm107_vm10, %v104_v6, %v106_v5  ;;  %v168_v9 = vsel %vm136_vm6, %v160_v4, %v106_v5 }
  0xa1   :  { %734 = vmatpush3.bf16.msra.mxu1 %v168_v9  ;;  %v165_v12 = vsel %vm136_vm6, %v158_v10, %v109_v8 }
  0xa2   :  { %189 = vmatprep.subr.bf16.mxu0 %v165_v12  ;;  %735 = vmatprep.subr.bf16.mxu1 %v788_v13 }
  0xa3   :  { %v111_v16 = vpop.permute.xlu1 %110  ;;  %v102_v17 = vpop.permute.xlu0 %101 }
  0xa4   :  { %v108_v18 = vsel %vm107_vm10, %v102_v17, %v104_v6 }
  0xa5   :  { %v162_v21 = vsel %vm136_vm6, %v156_v19, %v108_v18 }
  0xa6   :  { %190 = vmatpush1.bf16.msra.mxu0 %v162_v21 }
  0xa7   :  { %v115_v23 = vpop.permute.xlu1 %114  ;;  %v113_v24 = vpop.permute.xlu0 %112 }
  0xa8   :  { %v176_v26 = vsel %vm119_vm3, %v115_v23, 0  ;;  %v117_v27 = vsel %vm116_vm11, %v111_v16, %v113_v24  ;;  %v118_v29 = vsel %vm116_vm11, %v113_v24, %v115_v23 }
  0xa9   :  { %v174_v30 = vsel %vm119_vm3, %v118_v29, 0  ;;  %v185_v31 = vsel %vm129_vm4, %v176_v26, 0  ;;  %v172_v32 = vsel %vm119_vm3, %v117_v27, 0 }
  0xaa   :  { %714 = vmatprep.subr.msk.bf16.mxu0 %vm129_vm4, %v174_v30  ;;  %736 = vmatpush3.bf16.msra.mxu1 %v185_v31  ;;  %v181_v33 = vsel %vm129_vm4, %v172_v32, 0 }
  0xab   :  { %v388_v35 = vpop.permute.xlu1 %387  ;;  %192 = vmatpush1.bf16.msra.mxu0 %v181_v33  ;;  %v386_v36 = vpop.permute.xlu0 %385  ;;  %741 = vmatprep.subr.bf16.mxu1 %v788_v13 }
  0xac   :  { %v390_v41 = vsel %vm50_vm1, %v386_v36, %v388_v35  ;;  %v458_v43 = vsel %vm119_vm3, %v894_v25, %v388_v35 }
  0xad   :  { %738 = vmatmul.mubr.msk.bf16.vlgmr.msra.gmra.mrb[0].mxu1 %vm177_vm12, %v983_v34  ;;  %v455_v44 = vsel %vm119_vm3, %v909_v28, %v390_v41 }
  0xae   :  { %715 = vmatmul.mubr.msk.bf16.vlgmr.msra.gmra.mrb[0].mxu0 %vm177_vm12, %v983_v34  ;;  %747 = vmatprep.mubr.msk.bf16.mxu1 %vm794_vm0, %v788_v13  ;;  %vm330_vm0 = vcmask 523264  }
  0xaf   :  { %v396_v37 = vpop.permute.xlu1 %395  ;;  %v384_v38 = vpop.permute.xlu0 %383  ;;  %542 = vmatprep.mubr.bf16.mxu0 %v796_v20 }
  0xb0   :  { %v389_v48 = vsel %vm50_vm1, %v384_v38, %v386_v36  ;;  %vm318_vm1 = vcmask 818176  }
  0xb1   :  { %v452_v28 = vsel %vm119_vm3, %v885_v22, %v389_v48 }
  0xb3   :  { %v394_v39 = vpop.permute.xlu1 %393  ;;  %v398_v40 = vpop.permute.xlu0 %397 }
  0xb4   :  { %v400_v42 = vsel %vm61_vm2, %v396_v37, %v398_v40  ;;  %v464_v45 = vsel %vm129_vm4, %v458_v43, %v398_v40  ;;  %v399_v51 = vsel %vm61_vm2, %v394_v39, %v396_v37  ;;  %vm292_vm2 = vcmask 932864  }
  0xb5   :  { %v462_v50 = vsel %vm129_vm4, %v455_v44, %v400_v42  ;;  %v460_v54 = vsel %vm129_vm4, %v452_v28, %v399_v51 }
  0xb7   :  { %v407_v46 = vpop.permute.xlu1 %406  ;;  %v405_v47 = vpop.permute.xlu0 %404 }
  0xb8   :  { %v472_v20 = vsel %vm136_vm6, %v464_v45, %v407_v46  ;;  %v409_v49 = vsel %vm71_vm5, %v405_v47, %v407_v46 }
  0xb9   :  { %742 = vmatpush3.bf16.msra.mxu1 %v472_v20  ;;  %v469_v25 = vsel %vm136_vm6, %v462_v50, %v409_v49 }
  0xba   :  { %510 = vmatprep.subr.bf16.mxu0 %v469_v25  ;;  %743 = vmatprep.subr.bf16.mxu1 %v788_v13 }
  0xbb   :  { %v413_v52 = vpop.permute.xlu1 %412  ;;  %v403_v53 = vpop.permute.xlu0 %402 }
  0xbc   :  { %v408_v55 = vsel %vm71_vm5, %v403_v53, %v405_v47  ;;  %vm336_vm5 = vcmask 916480  }
  0xbd   :  { %v466_v56 = vsel %vm136_vm6, %v460_v54, %v408_v55 }
  0xbe   :  { %511 = vmatpush1.bf16.msra.mxu0 %v466_v56 }
  0xbf   :  { %v421_v57 = vpop.permute.xlu1 %420  ;;  %v415_v58 = vpop.permute.xlu0 %414 }
  0xc0   :  { %v417_v2 = vsel %vm80_vm9, %v413_v52, %v415_v58 }
  0xc3   :  { %v411_v59 = vpop.permute.xlu1 %410  ;;  %v423_v60 = vpop.permute.xlu0 %422 }
  0xc4   :  { %v425_v1 = vsel %vm89_vm7, %v421_v57, %v423_v60  ;;  %v482_v3 = vsel %vm119_vm3, %v415_v58, %v423_v60  ;;  %v416_v15 = vsel %vm80_vm9, %v411_v59, %v413_v52 }
  0xc5   :  { %v479_v4 = vsel %vm119_vm3, %v417_v2, %v425_v1 }
  0xc7   :  { %v429_v61 = vpop.permute.xlu1 %428  ;;  %v419_v62 = vpop.permute.xlu0 %418 }
  0xc8   :  { %v424_v8 = vsel %vm89_vm7, %v419_v62, %v421_v57 }
  0xc9   :  { %v476_v16 = vsel %vm119_vm3, %v416_v15, %v424_v8 }
  0xcb   :  { %v427_v63 = vpop.permute.xlu1 %426  ;;  %v431_v0 = vpop.permute.xlu0 %430 }
  0xcc   :  { %v433_v22 = vsel %vm98_vm8, %v429_v61, %v431_v0  ;;  %v488_v5 = vsel %vm129_vm4, %v482_v3, %v431_v0  ;;  %v432_v12 = vsel %vm98_vm8, %v427_v63, %v429_v61 }
  0xcd   :  { %v486_v11 = vsel %vm129_vm4, %v479_v4, %v433_v22  ;;  %v484_v19 = vsel %vm129_vm4, %v476_v16, %v432_v12 }
  0xcf   :  { %v439_v6 = vpop.permute.xlu1 %438  ;;  %v437_v7 = vpop.permute.xlu0 %436 }
  0xd0   :  { %v496_v9 = vsel %vm136_vm6, %v488_v5, %v439_v6  ;;  %v441_v10 = vsel %vm107_vm10, %v437_v7, %v439_v6 }
  0xd1   :  { %744 = vmatpush3.bf16.msra.mxu1 %v496_v9  ;;  %v493_v14 = vsel %vm136_vm6, %v486_v11, %v441_v10 }
  0xd2   :  { %512 = vmatprep.subr.bf16.mxu0 %v493_v14  ;;  %745 = vmatprep.subr.bf16.mxu1 %v788_v13 }
  0xd3   :  { %v443_v17 = vpop.permute.xlu1 %442  ;;  %v435_v18 = vpop.permute.xlu0 %434 }
  0xd4   :  { %v440_v21 = vsel %vm107_vm10, %v435_v18, %v437_v7 }
  0xd5   :  { %v490_v23 = vsel %vm136_vm6, %v484_v19, %v440_v21 }
  0xd6   :  { %513 = vmatpush1.bf16.msra.mxu0 %v490_v23 }
  0xd7   :  { %v447_v24 = vpop.permute.xlu1 %446  ;;  %v445_v26 = vpop.permute.xlu0 %444 }
  0xd8   :  { %v503_v27 = vsel %vm119_vm3, %v447_v24, 0  ;;  %v448_v29 = vsel %vm116_vm11, %v443_v17, %v445_v26  ;;  %v449_v30 = vsel %vm116_vm11, %v445_v26, %v447_v24 }
  0xd9   :  { %v508_v13 = vsel %vm129_vm4, %v503_v27, 0  ;;  %v499_v31 = vsel %vm119_vm3, %v448_v29, 0  ;;  %v501_v32 = vsel %vm119_vm3, %v449_v30, 0  ;;  %vm332_vm3 = vcmask 654336  }
  0xda   :  { %718 = vmatprep.subr.msk.bf16.mxu0 %vm129_vm4, %v501_v32  ;;  %746 = vmatpush3.bf16.msra.mxu1 %v508_v13  ;;  %v504_v33 = vsel %vm129_vm4, %v499_v31, 0  ;;  %vm334_vm4 = vcmask 785408  }
  0xdb   :  { %515 = vmatpush1.bf16.msra.mxu0 %v504_v33 }
  0xdd   :  { %748 = vmatmul.mubr.msk.bf16.vlgmr.msra.gmra.mrb[4].mxu1 %vm177_vm12, %v983_v34 }
  0xde   :  { %719 = vmatmul.mubr.msk.bf16.vlgmr.msra.gmra.mrb[4].mxu0 %vm177_vm12, %v983_v34 }
 0x180   :  { %v262_v35 = vpop.f32.mrb[0].mxu1 }
 0x181   :  { %316 = vrot.lane.b32.xlu1 %v262_v35, %s798_s1  ;;  %v1043_v36 = vpop.f32.mrb[0].mxu0  ;;  %v739_v37 = vpop.f32.mrb[1].mxu1 }
 0x182   :  { %269 = vrot.lane.b32.xlu0 %v1043_v36, %s789_s15  ;;  %v223_v38 = vpop.f32.mrb[1].mxu0  ;;  %v265_v39 = vpop.f32.mrb[2].mxu1 }
 0x183   :  { %v225_v40 = vpop.f32.mrb[2].mxu0  ;;  %v740_v41 = vpop.f32.mrb[3].mxu1 }
 0x184   :  { %v226_v42 = vpop.f32.mrb[3].mxu0 }
 0x185   :  { %288 = vrot.lane.b32.xlu1 %v1043_v36, %s799_s25 }
 0x186   :  { %272 = vrot.lane.b32.xlu0 %v1043_v36, %s800_s26 }
 0x189   :  { %295 = vrot.lane.b32.xlu1 %v223_v38, %s801_s27 }
 0x18a   :  { %275 = vrot.lane.b32.xlu0 %v1043_v36, %s802_s28 }
 0x18d   :  { %301 = vrot.lane.b32.xlu1 %v223_v38, %s792_s18 }
 0x18e   :  { %278 = vrot.lane.b32.xlu0 %v1043_v36, %s803_s29 }
 0x191   :  { %304 = vrot.lane.b32.xlu1 %v223_v38, %s804_s30 }
 0x192   :  { %281 = vrot.lane.b32.xlu0 %v1043_v36, %s805_s4 }
 0x195   :  { %307 = vrot.lane.b32.xlu1 %v223_v38, %s806_s5 }
 0x196   :  { %284 = vrot.lane.b32.xlu0 %v1043_v36, %s807_s6 }
 0x199   :  { %310 = vrot.lane.b32.xlu1 %v223_v38, %s808_s7 }
 0x19a   :  { %298 = vrot.lane.b32.xlu0 %v223_v38, %s790_s16 }
 0x19e   :  { %314 = vrot.lane.b32.xlu0 %v223_v38, %s798_s1 }
 0x1a2   :  { %290 = vrot.lane.b32.xlu0 %v223_v38, %s799_s25 }
 0x1b0   :  { %v585_v34 = vpop.f32.mrb[4].mxu1 }
 0x1b1   :  { %638 = vrot.lane.b32.xlu1 %v585_v34, %s798_s1  ;;  %v1061_v43 = vpop.f32.mrb[4].mxu0  ;;  %v749_v44 = vpop.f32.mrb[5].mxu1 }
 0x1b2   :  { %v588_v45 = vpop.f32.mrb[6].mxu1  ;;  %595 = vrot.lane.b32.xlu0 %v1061_v43, %s800_s26  ;;  %v546_v46 = vpop.f32.mrb[5].mxu0 }
 0x1b3   :  { %v548_v47 = vpop.f32.mrb[6].mxu0  ;;  %v750_v48 = vpop.f32.mrb[7].mxu1 }
 0x1b4   :  { %v549_v20 = vpop.f32.mrb[7].mxu0 }
 0x1b5   :  { %592 = vrot.lane.b32.xlu1 %v1061_v43, %s789_s15 }
 0x1b6   :  { %598 = vrot.lane.b32.xlu0 %v1061_v43, %s802_s28 }
 0x1b9   :  { %607 = vrot.lane.b32.xlu1 %v1061_v43, %s807_s6 }
 0x1ba   :  { %601 = vrot.lane.b32.xlu0 %v1061_v43, %s803_s29 }
 0x1bd   :  { %620 = vrot.lane.b32.xlu1 %v546_v46, %s790_s16 }
 0x1be   :  { %604 = vrot.lane.b32.xlu0 %v1061_v43, %s805_s4 }
 0x1c1   :  { %623 = vrot.lane.b32.xlu1 %v546_v46, %s792_s18 }
 0x1c2   :  { %611 = vrot.lane.b32.xlu0 %v1061_v43, %s799_s25 }
 0x1c5   :  { %626 = vrot.lane.b32.xlu1 %v546_v46, %s804_s30 }
 0x1c6   :  { %617 = vrot.lane.b32.xlu0 %v546_v46, %s801_s27 }
 0x1c9   :  { %629 = vrot.lane.b32.xlu1 %v546_v46, %s806_s5 }
 0x1ca   :  { %636 = vrot.lane.b32.xlu0 %v546_v46, %s798_s1 }
 0x1cd   :  { %632 = vrot.lane.b32.xlu1 %v546_v46, %s808_s7 }
 0x1ce   :  { %321 = vrot.lane.b32.xlu0 %v262_v35, %s809_s8 }
 0x1d1   :  { %613 = vrot.lane.b32.xlu1 %v546_v46, %s799_s25 }
 0x1d5   :  { %642 = vrot.lane.b32.xlu1 %v585_v34, %s809_s8 }
 0x1f3   :  { %v317_v51 = vpop.permute.xlu1 %316 }
 0x1f4   :  { %v270_v49 = vpop.permute.xlu0 %269 }
 0x1f5   :  { %v325_v14 = vsel %vm324_vm13, %v1043_v36, %v270_v49 }
 0x1f7   :  { %v289_v28 = vpop.permute.xlu1 %288 }
 0x1f8   :  { %v273_v50 = vpop.permute.xlu0 %272 }
 0x1f9   :  { %v327_v18 = vsel %vm326_vm14, %v325_v14, %v273_v50 }
 0x1fb   :  { %v296_v53 = vpop.permute.xlu1 %295 }
 0x1fc   :  { %v276_v25 = vpop.permute.xlu0 %275 }
 0x1fd   :  { %v329_v21 = vsel %vm328_vm15, %v327_v18, %v276_v25 }
 0x1ff   :  { %v302_v55 = vpop.permute.xlu1 %301 }
 0x200   :  { %v279_v52 = vpop.permute.xlu0 %278 }
 0x201   :  { %v331_v30 = vsel %vm330_vm0, %v329_v21, %v279_v52 }
 0x203   :  { %v305_v57 = vpop.permute.xlu1 %304 }
 0x204   :  { %v282_v54 = vpop.permute.xlu0 %281 }
 0x205   :  { %v333_v31 = vsel %vm332_vm3, %v331_v30, %v282_v54 }
 0x207   :  { %v308_v59 = vpop.permute.xlu1 %307 }
 0x208   :  { %v285_v56 = vpop.permute.xlu0 %284 }
 0x209   :  { %v335_v33 = vsel %vm334_vm4, %v333_v31, %v285_v56 }
 0x20b   :  { %v311_v61 = vpop.permute.xlu1 %310 }
 0x20c   :  { %v299_v58 = vpop.permute.xlu0 %298 }
 0x20d   :  { %v338_v6 = vsel %vm324_vm13, %v296_v53, %v299_v58 }
 0x20e   :  { %v339_v8 = vsel %vm326_vm14, %v338_v6, %v302_v55 }
 0x20f   :  { %v340_v10 = vsel %vm328_vm15, %v339_v8, %v305_v57 }
 0x210   :  { %v315_v60 = vpop.permute.xlu0 %314  ;;  %v341_v17 = vsel %vm330_vm0, %v340_v10, %v308_v59 }
 0x211   :  { %v319_v24 = vsel %vm318_vm1, %v315_v60, %v317_v51  ;;  %v342_v29 = vsel %vm332_vm3, %v341_v17, %v311_v61 }
 0x212   :  { %v343_v37 = vsel %vm334_vm4, %v342_v29, %v319_v24 }
 0x214   :  { %v291_v62 = vpop.permute.xlu0 %290 }
 0x215   :  { %v293_v13 = vsel %vm292_vm2, %v289_v28, %v291_v62 }
 0x216   :  { %v337_v41 = vsel %vm336_vm5, %v335_v33, %v293_v13 }
 0x217   :  { %v349_v48 = vmul.f32 %v337_v41, %v337_v41 }
 0x223   :  { %v639_v63 = vpop.permute.xlu1 %638 }
 0x224   :  { %v596_v0 = vpop.permute.xlu0 %595 }
 0x227   :  { %v593_v1 = vpop.permute.xlu1 %592 }
 0x228   :  { %v599_v22 = vpop.permute.xlu0 %598  ;;  %v645_v15 = vsel %vm324_vm13, %v1061_v43, %v593_v1 }
 0x229   :  { %v646_v26 = vsel %vm326_vm14, %v645_v15, %v596_v0 }
 0x22a   :  { %v647_v35 = vsel %vm328_vm15, %v646_v26, %v599_v22 }
 0x22b   :  { %v608_v2 = vpop.permute.xlu1 %607 }
 0x22c   :  { %v602_v3 = vpop.permute.xlu0 %601 }
 0x22d   :  { %v648_v39 = vsel %vm330_vm0, %v647_v35, %v602_v3 }
 0x22f   :  { %v621_v4 = vpop.permute.xlu1 %620 }
 0x230   :  { %v605_v5 = vpop.permute.xlu0 %604 }
 0x231   :  { %v649_v42 = vsel %vm332_vm3, %v648_v39, %v605_v5  ;;  %v16_v5 = vld [vmem:[%s1125_s2] sm:$0xff] }
 0x232   :  { %v650_v20 = vsel %vm334_vm4, %v649_v42, %v608_v2 }
 0x233   :  { %v624_v7 = vpop.permute.xlu1 %623 }
 0x234   :  { %v612_v9 = vpop.permute.xlu0 %611 }
 0x237   :  { %v627_v11 = vpop.permute.xlu1 %626 }
 0x238   :  { %v618_v12 = vpop.permute.xlu0 %617 }
 0x239   :  { %v652_v16 = vsel %vm324_vm13, %v618_v12, %v621_v4  ;;  %v810_v4 = vmov 1  }
 0x23a   :  { %v653_v27 = vsel %vm326_vm14, %v652_v16, %v624_v7  ;;  %778 = vset.pattern.permute.xlu1 %v810_v4 }
 0x23b   :  { %v630_v19 = vpop.permute.xlu1 %629  ;;  %v654_v36 = vsel %vm328_vm15, %v653_v27, %v627_v11 }
 0x23c   :  { %v637_v23 = vpop.permute.xlu0 %636  ;;  %v655_v44 = vsel %vm330_vm0, %v654_v36, %v630_v19 }
 0x23d   :  { %v640_v49 = vsel %vm318_vm1, %v637_v23, %v639_v63 }
 0x23f   :  { %v633_v32 = vpop.permute.xlu1 %632 }
 0x240   :  { %v322_v38 = vpop.permute.xlu0 %321  ;;  %v656_v46 = vsel %vm332_vm3, %v655_v44, %v633_v32 }
 0x241   :  { %v344_v40 = vsel %vm336_vm5, %v343_v37, %v322_v38  ;;  %v657_v28 = vsel %vm334_vm4, %v656_v46, %v640_v49 }
 0x242   :  { %v345_v34 = vadd.f32 %v344_v40, %v337_v41  ;;  %v350_v43 = vmul.f32 %v344_v40, %v344_v40 }
 0x243   :  { %v614_v45 = vpop.permute.xlu1 %613 }
 0x244   :  { %v615_v47 = vsel %vm292_vm2, %v612_v9, %v614_v45  ;;  %346 = vadd.xlane.f32.xlu0 %v345_v34  ;;  %v351_v50 = vadd.f32 %v350_v43, %v349_v48 }
 0x245   :  { %v651_v51 = vsel %vm336_vm5, %v650_v20, %v615_v47 }
 0x246   :  { %v663_v54 = vmul.f32 %v651_v51, %v651_v51 }
 0x247   :  { %v643_v25 = vpop.permute.xlu1 %642 }
 0x248   :  { %v658_v52 = vsel %vm336_vm5, %v657_v28, %v643_v25  ;;  %352 = vadd.xlane.f32.xlu0 %v351_v50 }
 0x249   :  { %v659_v53 = vadd.f32 %v658_v52, %v651_v51  ;;  %v664_v55 = vmul.f32 %v658_v52, %v658_v52 }
 0x24b   :  { %660 = vadd.xlane.f32.xlu1 %v659_v53  ;;  %v665_v56 = vadd.f32 %v664_v55, %v663_v54 }
 0x24d   :  { %666 = vadd.xlane.f32.xlu0 %v665_v56 }
 0x2d1   :  { %v347_v57 = vpop.xlane.xlu0 %346 }
 0x2d5   :  { %v353_v58 = vpop.xlane.xlu0 %352 }
 0x2d8   :  { %v661_v59 = vpop.xlane.xlu1 %660 }
 0x2d9   :  { %v662_v60 = vadd.f32 %v661_v59, %v347_v57 }
 0x2da   :  { %v667_v61 = vpop.xlane.xlu0 %666 }
 0x2db   :  { %v669_v62 = vmul.f32 0.001953125, %v662_v60  ;;  %v668_v63 = vadd.f32 %v667_v61, %v353_v58 }
 0x2dd   :  { %v671_v0 = vmul.f32 %v669_v62, %v669_v62  ;;  %v670_v1 = vmul.f32 0.001953125, %v668_v63 }
 0x2df   :  { %v672_v22 = vsub.f32 %v670_v1, %v671_v0 }
 0x2e1   :  { %v673_v2 = vmax.f32 %v672_v22, 0.0 }
 0x2e3   :  { %v674_v3 = vadd.f32 1e-05, %v673_v2 }
 0x2e5   :  { %784 = vrsqrt.f32 %v674_v3 }
 0x2ef   :  { %v785_v6 = vpop.eup %784 }
 0x2f0   :  { %v676_v7 = vmul.f32 %v785_v6, %v16_v5 }
 0x2f2   :  { %685 = vperm.xlu0 %777, %v676_v7   ;;  %v677_v8 = vmul.f32 %v676_v7, %v669_v62 }
 0x2f4   :  { %679 = vrot.lane.b32.xlu1 %v677_v8, %s811_s11 }
 0x2f6   :  { %779 = vset.pattern.permute.xlu0 %v810_v4 }
 0x366   :  { %v680_v9 = vpop.permute.xlu1 %679 }
 0x367   :  { %v682_v10 = vsub.f32 %v16_v5, %v680_v9 }
 0x369   :  { %692 = vperm.xlu1 %778, %v682_v10  }
 0x371   :  { %v686_v11 = vpop.permute.xlu0 %685 }
 0x372   :  { %v688_v12 = vmul.f32 %v686_v11, %v337_v41  ;;  %v689_v14 = vmul.f32 %v686_v11, %v344_v40  ;;  %v701_v15 = vmul.f32 %v686_v11, %v651_v51  ;;  %v702_v16 = vmul.f32 %v686_v11, %v658_v52 }
 0x3e8   :  { %v693_v17 = vpop.permute.xlu1 %692 }
 0x3e9   :  { %v695_v18 = vadd.f32 %v693_v17, %v688_v12  ;;  %v696_v19 = vadd.f32 %v693_v17, %v689_v14  ;;  %v703_v21 = vadd.f32 %v701_v15, %v693_v17  ;;  %v704_v23 = vadd.f32 %v702_v16, %v693_v17 }
 0x3eb   :  { %v697_v24 = vmax.f32 %v695_v18, 0.0  ;;  %v698_v26 = vmax.f32 %v696_v19, 0.0  ;;  %v705_v27 = vmax.f32 %v703_v21, 0.0  ;;  %v706_v29 = vmax.f32 %v704_v23, 0.0 }
 0x3ed   :  { %699 = vst [vmem:[%s1126_s3] sm:$0xff] %v697_v24  ;;  %700 = vst [vmem:[%s1126_s3 + $0x8] sm:$0xff] %v698_v26 }
 0x3ee   :  { %721 = vst [vmem:[%s1126_s3 + $0x10] sm:$0xff] %v705_v27  ;;  %722 = vst [vmem:[%s1126_s3 + $0x18] sm:$0xff] %v706_v29 }

</bundles_post_ra>
